<compile_context>
chip_gen: v7x
topology: tpu7x:2x2x1
jax: 0.10.0
libtpu: 0.0.40
codegen_flags: <defaults>
</compile_context>

<pallas_src>
import functools
import math

import jax
import jax.numpy as jnp
from jax.experimental import pallas as pl
from jax.experimental.pallas import tpu as pltpu


_SQRT_HALF = 0.7071067811865476


def _erf_f32(z):
    """erf via Abramowitz & Stegun 7.1.26 (max abs err ~1.5e-7), f32.

    Built only from exp / mul / add / where / reciprocal so it lowers cleanly
    to the TPU VPU + EUP (no dependence on an erf lowering rule).
    """
    a1 = 0.254829592
    a2 = -0.284496736
    a3 = 1.421413741
    a4 = -1.453152027
    a5 = 1.061405429
    p = 0.3275911
    za = jnp.abs(z)
    # approx reciprocal -> EUP slot (frees the VALU, which binds once the
    # matmuls are single-pass bf16).
    t = pl.reciprocal(1.0 + p * za, approx=True)
    poly = ((((a5 * t + a4) * t + a3) * t + a2) * t + a1) * t
    e = 1.0 - poly * jnp.exp(-za * za)
    return jnp.where(z >= 0.0, e, -e)


def _gelu_exact_f32(h):
    # Matches torch.nn.GELU() default (erf-based, not tanh approximation).
    return 0.5 * h * (1.0 + _erf_f32(h * _SQRT_HALF))


def _mlp_kernel(x_ref, w1_ref, b1_ref, w2_ref, b2_ref, o_ref, acc_ref,
                *, precision):
    # grid = (row_tiles, hidden_tiles); hidden axis is the reduction axis.
    # x_ref : (TM, Din)       row tile of tokens
    # w1_ref: (Din, TDH)      fc1 weight tile (pre-transposed: x @ W1)
    # b1_ref: (1, TDH)        fc1 bias tile (f32)
    # w2_ref: (TDH, Dout)     fc2 weight tile (pre-transposed)
    # b2_ref: (1, Dout)       fc2 bias (f32)
    # o_ref : (TM, Dout)
    # acc_ref: (TM, Dout) f32 accumulator scratch
    k = pl.program_id(1)
    nk = pl.num_programs(1)

    @pl.when(k == 0)
    def _():
        acc_ref[...] = jnp.zeros_like(acc_ref)

    x = x_ref[...].astype(w1_ref.dtype)     # bf16 MXU operands for bf16 weights
    h = jnp.dot(x, w1_ref[...],
                preferred_element_type=jnp.float32, precision=precision)
    h = h + b1_ref[...]                     # bias add in f32
    h = _gelu_exact_f32(h)                  # exact (erf) GELU in f32
    # Dropout(p=0.0) is the identity -> nothing to do.
    h = h.astype(w2_ref.dtype)
    acc_ref[...] += jnp.dot(h, w2_ref[...],
                            preferred_element_type=jnp.float32,
                            precision=precision)

    @pl.when(k == nk - 1)
    def _():
        o_ref[...] = (acc_ref[...] + b2_ref[...]).astype(o_ref.dtype)


def _round_up(x, m):
    return (x + m - 1) // m * m


def _vmem_capacity_bytes():
    try:
        return int(pltpu.get_tpu_info().vmem_capacity_bytes)
    except Exception:
        return 64 * 1024 * 1024  # conservative (v7x-sized) fallback


def _choose_tiling(rows, din, dh, dout, x_isize, w_isize, o_isize, sublane,
                   vmem_cap, tile_rows=None, hidden_tile=None):
    """Pick (row_tile, hidden_tile, estimated_vmem_bytes)."""
    budget = int(vmem_cap * 0.7)
    default_target = 512 if vmem_cap >= (96 << 20) else 256

    if tile_rows is not None:
        tm_targets = [int(tile_rows)]
    else:
        tm_targets = sorted({t for t in (default_target, 256, 128, 64, 32)
                             if t <= default_target}, reverse=True)

    # Keep >= 4 row tiles when there are enough rows so the "parallel" row
    # axis gives each TensorCore (2 on v7x) at least 2 pipelined steps.
    def make_tm(target):
        tm = min(target, _round_up(pl.cdiv(rows, 4), sublane))
        return max(tm, sublane)

    if hidden_tile is not None:
        tdh_list = [min(int(hidden_tile), dh)]
    else:
        tdh_list = [dh] + [t for t in (2048, 1024, 512, 256) if t < dh]

    def est(tm, tdh):
        nk = pl.cdiv(dh, tdh)
        wbuf = 1 if nk == 1 else 2  # resident (single copy) vs streamed (2 bufs)
        return (wbuf * (din * tdh + tdh * dout) * w_isize  # W1/W2 tiles
                + (wbuf * tdh + dout) * 4                  # f32 biases
                + 2 * tm * din * x_isize                   # x tile (double buf)
                + 2 * tm * dout * o_isize                  # out tile (double buf)
                + tm * dout * 4                            # f32 accumulator
                + 2 * tm * tdh * 4)                        # h intermediate headroom

    best = None
    for tdh in tdh_list:
        for target in tm_targets:
            tm = make_tm(target)
            need = est(tm, tdh)
            if best is None or need < best[2]:
                best = (tm, tdh, need)
            if need <= budget:
                return tm, tdh, need
    return best


def mlp_forward(x, w1, b1, w2, b2, *, tile_rows=None, hidden_tile=None,
                precision=None, interpret=False):
    """Fused Mlp forward.

    x : (..., Din)
    w1: (Din, Dh)   (torch fc1.weight transposed)
    b1: (Dh,)
    w2: (Dh, Dout)  (torch fc2.weight transposed)
    b2: (Dout,)
    returns (..., Dout), dtype of x.
    Matmuls run at DEFAULT MXU precision with f32 accumulation (bf16 inputs
    give single-pass bf16 MXU).
    """
    *lead, din = x.shape
    dh = w1.shape[1]
    dout = w2.shape[1]
    rows = math.prod(lead) if lead else 1

    xm = x.reshape(rows, din)

    x_isize = jnp.dtype(x.dtype).itemsize
    w_isize = jnp.dtype(w1.dtype).itemsize
    o_isize = x_isize
    sublane = {4: 8, 2: 16, 1: 32}.get(x_isize, 8)
    vmem_cap = _vmem_capacity_bytes()

    tm, tdh, need = _choose_tiling(rows, din, dh, dout, x_isize, w_isize,
                                   o_isize, sublane, vmem_cap,
                                   tile_rows, hidden_tile)
    if tdh < dh:
        assert tdh % 128 == 0, f"hidden tile {tdh} must be a multiple of 128"

    # --- pad rows to a tile multiple ---
    padded_rows = _round_up(rows, tm)
    if padded_rows != rows:
        xm = jnp.pad(xm, ((0, padded_rows - rows), (0, 0)))

    # --- pad hidden dim to a tile multiple (zero padding is exact: padded
    #     hidden units are gelu(0 + 0) = 0 and hit zero rows of W2) ---
    b1_2d = b1.reshape(1, dh).astype(jnp.float32)
    b2_2d = b2.reshape(1, dout).astype(jnp.float32)
    padded_dh = _round_up(dh, tdh)
    if padded_dh != dh:
        w1 = jnp.pad(w1, ((0, 0), (0, padded_dh - dh)))
        b1_2d = jnp.pad(b1_2d, ((0, 0), (0, padded_dh - dh)))
        w2 = jnp.pad(w2, ((0, padded_dh - dh), (0, 0)))

    nk = padded_dh // tdh
    grid = (padded_rows // tm, nk)

    if nk == 1:
        # Whole weights live in VMEM once for the entire grid: single copy,
        # no per-step weight DMA, half the footprint of double buffering.
        w1_spec = pl.BlockSpec(memory_space=pltpu.MemorySpace.VMEM)
        b1_spec = pl.BlockSpec(memory_space=pltpu.MemorySpace.VMEM)
        w2_spec = pl.BlockSpec(memory_space=pltpu.MemorySpace.VMEM)
    else:
        # Stream hidden-dim tiles of W1/b1/W2 (pipeline double-buffers them).
        w1_spec = pl.BlockSpec((din, tdh), lambda i, k: (0, k))
        b1_spec = pl.BlockSpec((1, tdh), lambda i, k: (0, k))
        w2_spec = pl.BlockSpec((tdh, dout), lambda i, k: (k, 0))
    b2_spec = pl.BlockSpec(memory_space=pltpu.MemorySpace.VMEM)

    vmem_limit = int(max(32 << 20,
                         min(int(vmem_cap * 0.75),
                             int(need * 1.4) + (4 << 20))))

    kernel = functools.partial(_mlp_kernel, precision=precision)

    out = pl.pallas_call(
        kernel,
        out_shape=jax.ShapeDtypeStruct((padded_rows, dout), x.dtype),
        grid_spec=pltpu.PrefetchScalarGridSpec(
            num_scalar_prefetch=0,
            grid=grid,
            in_specs=[
                pl.BlockSpec((tm, din), lambda i, k: (i, 0)),   # x row tile
                w1_spec,
                b1_spec,
                w2_spec,
                b2_spec,
            ],
            out_specs=pl.BlockSpec((tm, dout), lambda i, k: (i, 0)),
            scratch_shapes=[pltpu.VMEM((tm, dout), jnp.float32)],
        ),
        compiler_params=pltpu.CompilerParams(
            dimension_semantics=("parallel", "arbitrary"),
            vmem_limit_bytes=vmem_limit,
        ),
        interpret=interpret,
    )(xm, w1, b1_2d, w2, b2_2d)

    if padded_rows != rows:
        out = out[:rows]
    return out.reshape(*lead, dout)


def _reference(xv, w1v, b1v, w2v, b2v):
    # f32 reference with exact erf GELU (same math as the torch module).
    h = jnp.dot(xv.astype(jnp.float32), w1v.astype(jnp.float32),
                precision=jax.lax.Precision.HIGHEST) + b1v
    h = 0.5 * h * (1.0 + jax.scipy.special.erf(h * _SQRT_HALF))
    return jnp.dot(h, w2v.astype(jnp.float32),
                   precision=jax.lax.Precision.HIGHEST) + b2v


if __name__ == "__main__":
    # Small transformer-Mlp-like config: tokens (B, L, C), hidden = 2*C.
    B, L = 2, 128
    in_features = 128
    hidden_features = 256
    out_features = in_features  # module default: out_features = in_features

    key = jax.random.PRNGKey(0)
    kx, k1, kb1, k2, kb2 = jax.random.split(key, 5)

    # torch nn.Linear-style init scale; weights stored pre-transposed (x @ W^T).
    lim1 = 1.0 / math.sqrt(in_features)
    lim2 = 1.0 / math.sqrt(hidden_features)
    x_f32 = jax.random.normal(kx, (B, L, in_features), dtype=jnp.float32)
    w1_f32 = jax.random.uniform(k1, (in_features, hidden_features),
                                jnp.float32, -lim1, lim1)
    b1 = jax.random.uniform(kb1, (hidden_features,), jnp.float32, -lim1, lim1)
    w2_f32 = jax.random.uniform(k2, (hidden_features, out_features),
                                jnp.float32, -lim2, lim2)
    b2 = jax.random.uniform(kb2, (out_features,), jnp.float32, -lim2, lim2)

    # --- Test 1: bf16 activations + weights (fast single-pass bf16 MXU path) ---
    xb = x_f32.astype(jnp.bfloat16)
    w1b = w1_f32.astype(jnp.bfloat16)
    w2b = w2_f32.astype(jnp.bfloat16)
    out_bf16 = jax.block_until_ready(mlp_forward(xb, w1b, b1, w2b, b2))
    ref_bf16 = _reference(xb, w1b, b1, w2b, b2)
    assert out_bf16.shape == (B, L, out_features), out_bf16.shape
    err = float(jnp.max(jnp.abs(out_bf16.astype(jnp.float32) - ref_bf16)))
    assert err < 3e-2, f"bf16 path mismatch (max err {err})"

    # --- Test 2: f32 path with a ragged row count (exercises row padding) ---
    x32 = x_f32[:, :100, :]
    out_f32 = jax.block_until_ready(mlp_forward(x32, w1_f32, b1, w2_f32, b2))
    ref_f32 = _reference(x32, w1_f32, b1, w2_f32, b2)
    assert out_f32.shape == (B, 100, out_features), out_f32.shape
    err = float(jnp.max(jnp.abs(out_f32 - ref_f32)))
    # DEFAULT MXU precision (single-pass bf16, f32 accumulation) tolerance.
    assert err < 1e-1, f"f32 path mismatch (max err {err})"

    # --- Test 3: force hidden-dim reduction tiling (the large-Dh path) ---
    out_k = jax.block_until_ready(
        mlp_forward(x32, w1_f32, b1, w2_f32, b2, hidden_tile=128))
    err = float(jnp.max(jnp.abs(out_k - ref_f32)))
    assert err < 1e-1, f"hidden-tiled path mismatch (max err {err})"

    print("KERNEL_OK")
</pallas_src>

<mosaic_0001>
module attributes {stable_mosaic.version = 11 : i64} {
  func.func @_mlp_kernel(%arg0: i32, %arg1: i32, %arg2: memref<64x128xbf16, #tpu.memory_space<vmem>>, %arg3: memref<128x256xbf16, #tpu.memory_space<vmem>>, %arg4: memref<1x256xf32, #tpu.memory_space<vmem>>, %arg5: memref<256x128xbf16, #tpu.memory_space<vmem>>, %arg6: memref<1x128xf32, #tpu.memory_space<vmem>>, %arg7: memref<64x128xbf16, #tpu.memory_space<vmem>>, %arg8: memref<64x128xf32, #tpu.memory_space<vmem>>) attributes {dimension_semantics = [#tpu.dimension_semantics<parallel>, #tpu.dimension_semantics<arbitrary>], iteration_bounds = array<i64: 4, 1>, scalar_prefetch = 0 : i64, scratch_operands = 1 : i64, tpu.core_type = #tpu.core_type<tc>, window_params = [{transform_indices = @transform_0, window_bounds = array<i64: 64, 128>}, {pipeline_mode = #tpu.pipeline_mode<synchronous>, transform_indices = @transform_1, window_bounds = array<i64: 128, 256>}, {pipeline_mode = #tpu.pipeline_mode<synchronous>, transform_indices = @transform_2, window_bounds = array<i64: 1, 256>}, {pipeline_mode = #tpu.pipeline_mode<synchronous>, transform_indices = @transform_3, window_bounds = array<i64: 256, 128>}, {pipeline_mode = #tpu.pipeline_mode<synchronous>, transform_indices = @transform_4, window_bounds = array<i64: 1, 128>}, {transform_indices = @transform_5, window_bounds = array<i64: 64, 128>}]} {
    %c0_i32 = arith.constant 0 : i32
    %0 = arith.cmpi eq, %arg1, %c0_i32 : i32
    %1 = arith.extui %0 : i1 to i32
    %c0_i32_0 = arith.constant 0 : i32
    %2 = arith.cmpi ne, %1, %c0_i32_0 : i32
    scf.if %2 {
      %cst_29 = arith.constant 0.000000e+00 : f32
      %57 = vector.broadcast %cst_29 : f32 to vector<64x128xf32>
      %c0_30 = arith.constant 0 : index
      %c0_31 = arith.constant 0 : index
      %58 = vector.load %arg8[%c0_30, %c0_31] : memref<64x128xf32, #tpu.memory_space<vmem>>, vector<64x128xf32>
      tpu.vector_store %arg8[%c0_30, %c0_31], %57 {strides = array<i32>} : memref<64x128xf32, #tpu.memory_space<vmem>>, vector<64x128xf32>,
    } else {
    }
    %c0 = arith.constant 0 : index
    %c0_1 = arith.constant 0 : index
    %3 = vector.load %arg2[%c0, %c0_1] : memref<64x128xbf16, #tpu.memory_space<vmem>>, vector<64x128xbf16>
    %c0_2 = arith.constant 0 : index
    %c0_3 = arith.constant 0 : index
    %4 = vector.load %arg3[%c0_2, %c0_3] : memref<128x256xbf16, #tpu.memory_space<vmem>>, vector<128x256xbf16>
    %cst = arith.constant dense<0.000000e+00> : vector<64x256xf32>
    %5 = tpu.matmul %3, %4, %cst {dimension_numbers = #tpu.dot_dimension_numbers<[1], [0], [0], [1], [0, 0, 1, 1], [], []>} : vector<64x128xbf16>, vector<128x256xbf16>, vector<64x256xf32> -> vector<64x256xf32>
    %c0_4 = arith.constant 0 : index
    %c0_5 = arith.constant 0 : index
    %6 = vector.load %arg4[%c0_4, %c0_5] : memref<1x256xf32, #tpu.memory_space<vmem>>, vector<1x256xf32>
    %7 = vector.broadcast %6 : vector<1x256xf32> to vector<64x256xf32>
    %8 = arith.addf %5, %7 : vector<64x256xf32>
    %cst_6 = arith.constant 5.000000e-01 : f32
    %9 = vector.broadcast %cst_6 : f32 to vector<64x256xf32>
    %10 = arith.mulf %9, %8 : vector<64x256xf32>
    %cst_7 = arith.constant 0.707106769 : f32
    %11 = vector.broadcast %cst_7 : f32 to vector<64x256xf32>
    %12 = arith.mulf %8, %11 : vector<64x256xf32>
    %13 = math.absf %12 : vector<64x256xf32>
    %cst_8 = arith.constant 0.327591091 : f32
    %14 = vector.broadcast %cst_8 : f32 to vector<64x256xf32>
    %15 = arith.mulf %14, %13 : vector<64x256xf32>
    %cst_9 = arith.constant 1.000000e+00 : f32
    %16 = vector.broadcast %cst_9 : f32 to vector<64x256xf32>
    %17 = arith.addf %16, %15 : vector<64x256xf32>
    %18 = tpu.reciprocal %17 {approx = true} : vector<64x256xf32> -> vector<64x256xf32>
    %cst_10 = arith.constant 1.06140542 : f32
    %19 = vector.broadcast %cst_10 : f32 to vector<64x256xf32>
    %20 = arith.mulf %19, %18 : vector<64x256xf32>
    %cst_11 = arith.constant -1.45315206 : f32
    %21 = vector.broadcast %cst_11 : f32 to vector<64x256xf32>
    %22 = arith.addf %20, %21 : vector<64x256xf32>
    %23 = arith.mulf %22, %18 : vector<64x256xf32>
    %cst_12 = arith.constant 1.42141378 : f32
    %24 = vector.broadcast %cst_12 : f32 to vector<64x256xf32>
    %25 = arith.addf %23, %24 : vector<64x256xf32>
    %26 = arith.mulf %25, %18 : vector<64x256xf32>
    %cst_13 = arith.constant -0.284496725 : f32
    %27 = vector.broadcast %cst_13 : f32 to vector<64x256xf32>
    %28 = arith.addf %26, %27 : vector<64x256xf32>
    %29 = arith.mulf %28, %18 : vector<64x256xf32>
    %cst_14 = arith.constant 0.254829586 : f32
    %30 = vector.broadcast %cst_14 : f32 to vector<64x256xf32>
    %31 = arith.addf %29, %30 : vector<64x256xf32>
    %32 = arith.mulf %31, %18 : vector<64x256xf32>
    %cst_15 = arith.constant 0.000000e+00 : f32
    %33 = vector.broadcast %cst_15 : f32 to vector<64x256xf32>
    %34 = arith.subf %33, %13 : vector<64x256xf32>
    %35 = arith.mulf %34, %13 : vector<64x256xf32>
    %36 = math.exp %35 : vector<64x256xf32>
    %37 = arith.mulf %32, %36 : vector<64x256xf32>
    %cst_16 = arith.constant 1.000000e+00 : f32
    %38 = vector.broadcast %cst_16 : f32 to vector<64x256xf32>
    %39 = arith.subf %38, %37 : vector<64x256xf32>
    %cst_17 = arith.constant 0.000000e+00 : f32
    %40 = vector.broadcast %cst_17 : f32 to vector<64x256xf32>
    %41 = arith.cmpf oge, %12, %40 : vector<64x256xf32>
    %cst_18 = arith.constant 0.000000e+00 : f32
    %42 = vector.broadcast %cst_18 : f32 to vector<64x256xf32>
    %43 = arith.subf %42, %39 : vector<64x256xf32>
    %44 = arith.select %41, %39, %43 : vector<64x256xi1>, vector<64x256xf32>
    %cst_19 = arith.constant 1.000000e+00 : f32
    %45 = vector.broadcast %cst_19 : f32 to vector<64x256xf32>
    %46 = arith.addf %45, %44 : vector<64x256xf32>
    %47 = arith.mulf %10, %46 : vector<64x256xf32>
    %48 = arith.truncf %47 : vector<64x256xf32> to vector<64x256xbf16>
    %c0_20 = arith.constant 0 : index
    %c0_21 = arith.constant 0 : index
    %49 = vector.load %arg8[%c0_20, %c0_21] : memref<64x128xf32, #tpu.memory_space<vmem>>, vector<64x128xf32>
    %c0_22 = arith.constant 0 : index
    %c0_23 = arith.constant 0 : index
    %50 = vector.load %arg5[%c0_22, %c0_23] : memref<256x128xbf16, #tpu.memory_space<vmem>>, vector<256x128xbf16>
    %cst_24 = arith.constant dense<0.000000e+00> : vector<64x128xf32>
    %51 = tpu.matmul %48, %50, %cst_24 {dimension_numbers = #tpu.dot_dimension_numbers<[1], [0], [0], [1], [0, 0, 1, 1], [], []>} : vector<64x256xbf16>, vector<256x128xbf16>, vector<64x128xf32> -> vector<64x128xf32>
    %52 = arith.addf %49, %51 : vector<64x128xf32>
    %c0_25 = arith.constant 0 : index
    %c0_26 = arith.constant 0 : index
    %53 = vector.load %arg8[%c0_25, %c0_26] : memref<64x128xf32, #tpu.memory_space<vmem>>, vector<64x128xf32>
    tpu.vector_store %arg8[%c0_25, %c0_26], %52 {strides = array<i32>} : memref<64x128xf32, #tpu.memory_space<vmem>>, vector<64x128xf32>,
    %c0_i32_27 = arith.constant 0 : i32
    %54 = arith.cmpi eq, %arg1, %c0_i32_27 : i32
    %55 = arith.extui %54 : i1 to i32
    %c0_i32_28 = arith.constant 0 : i32
    %56 = arith.cmpi ne, %55, %c0_i32_28 : i32
    scf.if %56 {
      %c0_29 = arith.constant 0 : index
      %c0_30 = arith.constant 0 : index
      %57 = vector.load %arg8[%c0_29, %c0_30] : memref<64x128xf32, #tpu.memory_space<vmem>>, vector<64x128xf32>
      %c0_31 = arith.constant 0 : index
      %c0_32 = arith.constant 0 : index
      %58 = vector.load %arg6[%c0_31, %c0_32] : memref<1x128xf32, #tpu.memory_space<vmem>>, vector<1x128xf32>
      %59 = vector.broadcast %58 : vector<1x128xf32> to vector<64x128xf32>
      %60 = arith.addf %57, %59 : vector<64x128xf32>
      %61 = arith.truncf %60 : vector<64x128xf32> to vector<64x128xbf16>
      %c0_33 = arith.constant 0 : index
      %c0_34 = arith.constant 0 : index
      %62 = vector.load %arg7[%c0_33, %c0_34] : memref<64x128xbf16, #tpu.memory_space<vmem>>, vector<64x128xbf16>
      tpu.vector_store %arg7[%c0_33, %c0_34], %61 {strides = array<i32>} : memref<64x128xbf16, #tpu.memory_space<vmem>>, vector<64x128xbf16>,
    } else {
    }
    return
  }
  func.func @transform_0(%arg0: i32, %arg1: i32) -> (i32, i32) {
    %c0_i32 = arith.constant 0 : i32
    %c0_i32_0 = arith.constant 0 : i32
    return %arg0, %c0_i32 : i32, i32
  }
  func.func @transform_1(%arg0: i32, %arg1: i32) -> (i32, i32) {
    %c0_i32 = arith.constant 0 : i32
    %c0_i32_0 = arith.constant 0 : i32
    %c0_i32_1 = arith.constant 0 : i32
    return %c0_i32, %c0_i32_0 : i32, i32
  }
  func.func @transform_2(%arg0: i32, %arg1: i32) -> (i32, i32) {
    %c0_i32 = arith.constant 0 : i32
    %c0_i32_0 = arith.constant 0 : i32
    %c0_i32_1 = arith.constant 0 : i32
    return %c0_i32, %c0_i32_0 : i32, i32
  }
  func.func @transform_3(%arg0: i32, %arg1: i32) -> (i32, i32) {
    %c0_i32 = arith.constant 0 : i32
    %c0_i32_0 = arith.constant 0 : i32
    %c0_i32_1 = arith.constant 0 : i32
    return %c0_i32, %c0_i32_0 : i32, i32
  }
  func.func @transform_4(%arg0: i32, %arg1: i32) -> (i32, i32) {
    %c0_i32 = arith.constant 0 : i32
    %c0_i32_0 = arith.constant 0 : i32
    %c0_i32_1 = arith.constant 0 : i32
    return %c0_i32, %c0_i32_0 : i32, i32
  }
  func.func @transform_5(%arg0: i32, %arg1: i32) -> (i32, i32) {
    %c0_i32 = arith.constant 0 : i32
    %c0_i32_0 = arith.constant 0 : i32
    return %arg0, %c0_i32 : i32, i32
  }
}

</mosaic_0001>

<bundles_post_ra>
// kernel: tpu_custom_call.1
= control target key start
LH: loop header
LB: loop body
LE: loop exit
PB: predicated region body
PF: predicated region fallthrough
CT: control target
= control target key end

     0   :  { %10 = vsyncpa [#allocation4], 0  ;;  %s2574_s0 = inlined_call_operand.hbm [shape: bf16[256,128], index: 0, kind: input, shape index: {}]   ;;  %s2575_s1 = inlined_call_operand.hbm [shape: bf16[128,256], index: 1, kind: input, shape index: {}]   ;;  %s2576_s2 = inlined_call_operand.vmem [shape: f32[1,256], index: 2, kind: input, shape index: {}]   ;;  %s2577_s3 = inlined_call_operand.hbm [shape: bf16[256,128], index: 3, kind: input, shape index: {}]   ;;  %s2578_s4 = inlined_call_operand.vmem [shape: f32[1,128], index: 4, kind: input, shape index: {}]   ;;  %s2579_s5 = inlined_call_operand.hbm [shape: bf16[256,128], index: 5, kind: output, shape index: {}]  }
   0x1   :  { %12 = vsyncpa [#allocation4 + $0x1], 0 }
   0x2   :  { %13 = vsyncpa [#allocation7], 0 }
   0x3   :  { %14 = vsyncpa [#allocation5], 0 }
   0x4   :  { %16 = vsyncpa [#allocation5 + $0x1], 0  ;;  %s1883_s18 = smov 0   ;;  %s1885_s19 = smov 0  }
   0x5   :  { %s1887_s20 = smov 0   ;;  %s1889_s21 = smov 0  }
   0x6   :  { %s1891_s22 = smov 0   ;;  %s1893_s23 = smov 0  }
   0x7 LB: > { %s1333_s24 = sadd.s32 4294967295, %s1840_s23   ;;  %s1334_s25 = sadd.s32 4294967294, %s1840_s23   ;;  %s1840_s23 = sphi %s1893_s23, %s22_s23   ;;  %s1836_s22 = sphi %s1891_s22, %s2609_s22   ;;  %s1832_s21 = sphi %s1889_s21, %s2608_s21   ;;  %s1828_s20 = sphi %s1887_s20, %s2607_s20   ;;  %s1824_s19 = sphi %s1885_s19, %s2606_s19   ;;  %s1820_s18 = sphi %s1883_s18, %s2605_s18  }
   0x8   : > { %p54_p0 = scmp.ne.s32.totalorder %s1824_s19, %s1820_s18  ;;  %p1917_p1 = scmp.eq.s32.totalorder %s1333_s24, 0 }
   0x9   : > { %p1921_p2 = scmp.eq.s32.totalorder %s1333_s24, 3  ;;  %p168_p3 = scmp.eq.s32.totalorder %s1334_s25, 3 }
   0xa   : > { %s2585_s26 = scalar_select %p1917_p1, 1, 0 }
   0xb   : > { %s2586_s27 = scalar_select %p1921_p2, 1, 0 }
   0xc   : > { %p1927_p4 = por %p1917_p1, %p54_p0  ;;  %p1335_p5 = scmp.ge.s32.totalorder %s1840_s23, 1 }
   0xd   : > { %p1932_p6 = por %p168_p3, %p54_p0  ;;  %p175_p7 = scmp.lt.s32.totalorder %s1840_s23, 5 }
   0xe   : > { %s2587_s28 = scalar_select %p1927_p4, 1, 0 }
   0xf   : > { %s2588_s29 = scalar_select %p1932_p6, 1, 0 }
  0x10   : > { %p1937_p8 = pnand %p1335_p5, %p175_p7  ;;  %s1842_s6 = smov [#allocation6]  }
  0x11   : > { %s187_s7 = sshll.u32 %s1842_s6, 4  ;;  %s1843_s9 = smov [#allocation8]   ;;  %s188_s7 = int_to_ptr.vmem [resolvable:$true] %s187_s7 }
  0x12   : > { %s2589_s30 = scalar_select %p1937_p8, 1, 0 }
  0x13   : > { %p1482_p9 = pneg %p1937_p8  ;;  %s203_s10 = sshll.u32 %s1843_s9, 4  ;;  %s1949_s10 = int_to_ptr.vmem [resolvable:$true] %s203_s10 }
  0x14   : > { %s1668_s13 = scalar_lea.hbm %s2575_s1, 2048 }
  0x15   : > { %p1945_p10 = pnand %p1482_p9, %p1917_p1  ;;  %p1669_p11 = scmp.ne.s32.totalorder %s2575_s1, %s1668_s13 }
  0x16   : > { %p1675_p3 = scmp.lt.u32.totalorder %s1668_s13, %s2575_s1 }
  0x17   : > { %p1670_p12 = pneg %p1945_p10 }
  0x19   : > { %p1671_p13 = pnand %p1670_p12, %p1669_p11 }
  0x1b   : > { %p1672_p0 = pneg %p1671_p13 }
  0x1d   : > { %p1677_p5 = pnand %p1675_p3, %p1672_p0 }
  0x1f   : > { %1680 = shalt.err (!%p1677_p5)
}
  0x20   : > { %s1681_s24 = scalar_lea.vmem %s188_s7, 2048  ;;  %p1689_p1 = scmp.lt.s32.totalorder %s188_s7, %s188_s7 }
  0x21   : > { %p1682_p7 = scmp.ne.s32.totalorder %s188_s7, %s1681_s24  ;;  %p1690_p4 = scmp.lt.s32.totalorder %s1681_s24, %s1681_s24 }
  0x23   : > { %p1684_p9 = pnand %p1682_p7, %p1670_p12  ;;  %p1691_p8 = por %p1690_p4, %p1689_p1 }
  0x25   : > { %p1685_p6 = pneg %p1684_p9 }
  0x27   : > { %p1692_p2 = pnand %p1691_p8, %p1685_p6 }
  0x29   : > { %1695 = shalt.err (!%p1692_p2)
}
  0x2a   : > { %s1844_s25 = smov 128   ;;  %s1845_s6 = smov 8  }
  0x2b   : > { %1485 = dma.hbm_to_vmem [thread:$0]  (!%p1945_p10), %s2575_s1, 2048, %s188_s7, [#allocation7], %s1844_s25, %s1844_s25, %s1845_s6  }
  0x2c   : > { %s1696_s14 = scalar_lea.hbm %s2577_s3, 2048 }
  0x2d   : > { %p1697_p11 = scmp.ne.s32.totalorder %s2577_s3, %s1696_s14  ;;  %p1703_p4 = scmp.lt.u32.totalorder %s1696_s14, %s2577_s3 }
  0x2f   : > { %p1699_p1 = pnand %p1697_p11, %p1670_p12 }
  0x31   : > { %p1700_p2 = pneg %p1699_p1 }
  0x33   : > { %p1705_p6 = pnand %p1703_p4, %p1700_p2 }
  0x35   : > { %1708 = shalt.err (!%p1705_p6)
}
  0x36   : > { %s1709_s7 = scalar_lea.vmem %s1949_s10, 2048  ;;  %p1717_p3 = scmp.lt.s32.totalorder %s1949_s10, %s1949_s10 }
  0x37   : > { %p1710_p8 = scmp.ne.s32.totalorder %s1949_s10, %s1709_s7  ;;  %p1718_p5 = scmp.lt.s32.totalorder %s1709_s7, %s1709_s7 }
  0x39   : > { %p1712_p13 = pnand %p1710_p8, %p1670_p12  ;;  %p1719_p7 = por %p1718_p5, %p1717_p3 }
  0x3b   : > { %p1713_p0 = pneg %p1712_p13 }
  0x3d   : > { %p1720_p9 = pnand %p1719_p7, %p1713_p0 }
  0x3f   : > { %1723 = shalt.err (!%p1720_p9)
}
  0x40   : > { %s2584_s25 = smov 64   ;;  %s1847_s6 = smov 4  }
  0x41   : > { %1488 = dma.hbm_to_vmem [thread:$0]  (!%p1945_p10), %s2577_s3, 2048, %s1949_s10, [#allocation7], %s2584_s25, %s2584_s25, %s1847_s6  }
  0x42   : > { %s34_s12 = sadd.s32 1, %s1836_s22  ;;  %s41_s13 = sadd.s32 1, %s1828_s20 }
  0x43   : > { %p36_p12 = scmp.ge.s32.totalorder %s34_s12, 4  ;;  %p48_p11 = scmp.ne.s32.totalorder %s1828_s20, %s1824_s19 }
  0x44   : > { %p49_p1 = scmp.eq.s32.totalorder %s1840_s23, 0  ;;  %p1499_p2 = scmp.lt.s32.totalorder %s1840_s23, 4 }
  0x45   : > { %s2611_s12 = smov (%p36_p12, %s34_s12), 0  ;;  %p2591_p6 = scmp.ne.s32.totalorder %s2586_s27, 0 }
  0x46   : > { %p50_p4 = por %p49_p1, %p48_p11  ;;  %s38_s14 = ssub.s32 %s1836_s22, %s2611_s12 }
  0x47   : > { %p2011_p8 = por %p2591_p6, %p48_p11  ;;  %s220_s15 = sand.u32 1, %s1828_s20  }
  0x48   : > { %p39_p13 = scmp.eq.s32.totalorder %s38_s14, 0  ;;  %s1339_s10 = sshll.u32 %s220_s15, 5 }
  0x49   : > { %s1397_s16 = sshll.u32 %s1836_s22, 9  ;;  %s224_s27 = scalar_lea.vmem [#allocation3], %s1339_s10 }
  0x4a   : > { %s2020_s17 = scalar_select %p39_p13, %s1828_s20, %s41_s13  }
  0x4b   : > { %s2025_s9 = scalar_lea.hbm %s2574_s0, %s1397_s16  ;;  %s231_s11 = sshll.u32 %s224_s27, 4  ;;  %s2033_s11 = int_to_ptr.vmem [resolvable:$true] %s231_s11 }
  0x4c   : > { %p2029_p10 = pnand %p1499_p2, %p50_p4  ;;  %s2035_s13 = scalar_lea.sflag [#allocation4], %s220_s15 }
  0x4d   : > { %s1724_s14 = scalar_lea.hbm %s2025_s9, 512  ;;  %s1729_s24 = scalar_lea.hbm %s2574_s0, 2048 }
  0x4e   : > { %p1725_p0 = scmp.ne.s32.totalorder %s2025_s9, %s1724_s14  ;;  %p1726_p3 = pneg %p2029_p10 }
  0x4f   : > { %p1730_p9 = scmp.lt.u32.totalorder %s2025_s9, %s2574_s0  ;;  %p1731_p12 = scmp.lt.u32.totalorder %s1729_s24, %s1724_s14 }
  0x50   : > { %p1727_p5 = pnand %p1726_p3, %p1725_p0  ;;  %p1733_p1 = scmp.lt.u32.totalorder %s1724_s14, %s2025_s9 }
  0x51   : > { %p1732_p11 = por %p1731_p12, %p1730_p9 }
  0x52   : > { %p1728_p7 = pneg %p1727_p5 }
  0x53   : > { %p1734_p2 = por %p1733_p1, %p1732_p11 }
  0x55   : > { %p1735_p4 = pnand %p1734_p2, %p1728_p7 }
  0x57   : > { %1738 = shalt.err (!%p1735_p4)
}
  0x58   : > { %s1739_s15 = scalar_lea.vmem %s2033_s11, 512  ;;  %s1848_s10 = smov [#allocation3]  }
  0x59   : > { %p1740_p6 = scmp.ne.s32.totalorder %s2033_s11, %s1739_s15  ;;  %s1744_s16 = sshll.u32 %s1848_s10, 4  ;;  %s1745_s16 = int_to_ptr.vmem [resolvable:$false] %s1744_s16 }
  0x5a   : > { %s1746_s7 = scalar_lea.vmem %s1745_s16, 1024  ;;  %p1747_p5 = scmp.lt.s32.totalorder %s2033_s11, %s1745_s16 }
  0x5b   : > { %p1742_p13 = pnand %p1740_p6, %p1726_p3  ;;  %p1748_p9 = scmp.lt.s32.totalorder %s1746_s7, %s1739_s15 }
  0x5d   : > { %p1743_p0 = pneg %p1742_p13  ;;  %p1749_p12 = por %p1748_p9, %p1747_p5 }
  0x5f   : > { %p1750_p11 = pnand %p1749_p12, %p1743_p0 }
  0x61   : > { %1753 = shalt.err (!%p1750_p11)
}
  0x62   : > { %s2594_s14 = smov 64   ;;  %p2595_p3 = scmp.ne.s32.totalorder %s2589_s30, 0 }
  0x63   : > { %1492 = dma.hbm_to_vmem [thread:$0]  (!%p2029_p10), %s2025_s9, 512, %s2033_s11, %s2035_s13, %s2594_s14, %s2594_s14, %s1847_s6  }
  0x64   : > { %243 = sbr.rel (%p2595_p3) target bundleno = 727 (0x2d7), region = 40 }
  0x6b   : > { %s2069_s24 = sand.u32 1, %s1824_s19   ;;  %p2596_p7 = scmp.ne.s32.totalorder %s2587_s28, 0 }
  0x6c   : > { %s1343_s27 = sshll.u32 %s2069_s24, 5  ;;  %s246_s15 = scalar_lea.sflag [#allocation4], %s2069_s24 }
  0x6d   : > { %s2075_s25 = scalar_lea.vmem [#allocation3], %s1343_s27 }
  0x6e   : > { %1807 = dma.done.wait (%p2596_p7), %s246_s15, 512  }
  0x6f   : > { %1809 = vsyncadd (%p2596_p7), %s246_s15, 4294966784  ;;  %p2597_p10 = scmp.ne.s32.totalorder %s2585_s26, 0 }
  0x71   : > { %1811 = dma.done.wait (%p2597_p10), [#allocation7], 4096  }
  0x72   : > { %1813 = vsyncadd (%p2597_p10), [#allocation7], 4294963200  ;;  %v1849_v0 = vmov 0   ;;  %v1560_v1 = vld [vmem:[#allocation6 + $0x4] ss:$8 sps:$4 sm:$0xff]   ;;  %v1586_v19 = vld [vmem:[%s2075_s25 + $0x10] sm:$0xff]   ;;  %v325_v37 = vlaneseq }
  0x73   : > { %471 = vmatprep.mubr.bf16.mxu0 %v1849_v0  ;;  %v1562_v2 = vld [vmem:[#allocation6] ss:$8 sps:$4 sm:$0xff]   ;;  %439 = vmatprep.subr.bf16.mxu0 %v1560_v1  ;;  %v1563_v3 = vld [vmem:[#allocation6 + $0x14] ss:$8 sps:$4 sm:$0xff]   ;;  %v1565_v4 = vld [vmem:[#allocation6 + $0x10] ss:$8 sps:$4 sm:$0xff]  }
  0x74   : > { %440 = vmatpush1.bf16.msra.mxu0 %v1562_v2  ;;  %v1566_v5 = vld [vmem:[#allocation6 + $0x24] ss:$8 sps:$4 sm:$0xff]   ;;  %v1568_v6 = vld [vmem:[#allocation6 + $0x20] ss:$8 sps:$4 sm:$0xff]   ;;  %v1569_v7 = vld [vmem:[#allocation6 + $0x34] ss:$8 sps:$4 sm:$0xff]  }
  0x75   : > { %441 = vmatprep.subr.bf16.mxu0 %v1563_v3  ;;  %v1571_v8 = vld [vmem:[#allocation6 + $0x30] ss:$8 sps:$4 sm:$0xff]   ;;  %v1572_v9 = vld [vmem:[#allocation6 + $0x44] ss:$8 sps:$4 sm:$0xff]   ;;  %v1574_v10 = vld [vmem:[#allocation6 + $0x40] ss:$8 sps:$4 sm:$0xff]  }
  0x76   : > { %v1575_v11 = vld [vmem:[#allocation6 + $0x54] ss:$8 sps:$4 sm:$0xff]   ;;  %v1577_v12 = vld [vmem:[#allocation6 + $0x50] ss:$8 sps:$4 sm:$0xff]   ;;  %v1578_v13 = vld [vmem:[#allocation6 + $0x64] ss:$8 sps:$4 sm:$0xff]  }
  0x77   : > { %v1580_v14 = vld [vmem:[#allocation6 + $0x60] ss:$8 sps:$4 sm:$0xff]   ;;  %v1581_v15 = vld [vmem:[#allocation6 + $0x74] ss:$8 sps:$4 sm:$0xff]   ;;  %v1583_v16 = vld [vmem:[#allocation6 + $0x70] ss:$8 sps:$4 sm:$0xff]  }
  0x78   : > { %442 = vmatpush1.bf16.msra.mxu0 %v1565_v4  ;;  %v1584_v17 = vld [vmem:[%s2075_s25] sm:$0xff]   ;;  %v1585_v18 = vld [vmem:[%s2075_s25 + $0x8] sm:$0xff]   ;;  %v1587_v20 = vld [vmem:[%s2075_s25 + $0x18] sm:$0xff]   ;;  %v326_v38 = vshrl.u32 %v325_v37, 7  ;;  %s2513_s9 = scalar_lea.vmem [#allocation9], %s1343_s27  ;;  %s1406_s13 = sshll.u32 %s1832_s21, 9 }
  0x79   : > { %443 = vmatprep.subr.bf16.mxu0 %v1566_v5  ;;  %v1588_v21 = vld [vmem:[#allocation8 + $0x40] sm:$0xff]   ;;  %v1590_v23 = vld [vmem:[#allocation8 + $0x48] sm:$0xff]   ;;  %v1592_v25 = vld [vmem:[#allocation8 + $0x50] sm:$0xff]   ;;  %s1233_s11 = sshll.u32 %s2513_s9, 4  ;;  %s2525_s7 = scalar_lea.hbm %s2579_s5, %s1406_s13  ;;  %s2520_s11 = int_to_ptr.vmem [resolvable:$true] %s1233_s11 }
  0x7a   : > { %1430 = vmatprep.subr.bf16.mxu1 %v1588_v21  ;;  %v1589_v22 = vld [vmem:[#allocation8] sm:$0xff]   ;;  %v1591_v24 = vld [vmem:[#allocation8 + $0x8] sm:$0xff]   ;;  %v1593_v26 = vld [vmem:[#allocation8 + $0x10] sm:$0xff]   ;;  %v327_v39 = vsub.s32 0, %v326_v38  ;;  %v331_v41 = vsub.s32 1, %v326_v38  ;;  %s1220_s14 = scalar_lea.sflag [#allocation5], %s2069_s24 }
  0x7b   : > { %1431 = vmatpush3.bf16.msra.mxu1 %v1589_v22  ;;  %v1594_v27 = vld [vmem:[#allocation8 + $0x58] sm:$0xff]   ;;  %v1596_v29 = vld [vmem:[#allocation8 + $0x60] sm:$0xff]   ;;  %v1598_v31 = vld [vmem:[#allocation8 + $0x68] sm:$0xff]   ;;  %s1754_s27 = scalar_lea.vmem %s2520_s11, 512  ;;  %s1850_s21 = smov [#allocation9]  }
  0x7c   : > { %444 = vmatpush1.bf16.msra.mxu0 %v1568_v6  ;;  %1432 = vmatprep.subr.bf16.mxu1 %v1590_v23  ;;  %v1595_v28 = vld [vmem:[#allocation8 + $0x18] sm:$0xff]   ;;  %v1597_v30 = vld [vmem:[#allocation8 + $0x20] sm:$0xff]   ;;  %v1599_v32 = vld [vmem:[#allocation8 + $0x28] sm:$0xff]   ;;  %p1755_p1 = scmp.ne.s32.totalorder %s2520_s11, %s1754_s27  ;;  %s1758_s15 = sshll.u32 %s1850_s21, 4  ;;  %s1759_s15 = int_to_ptr.vmem [resolvable:$false] %s1758_s15 }
  0x7d   : > { %445 = vmatprep.subr.bf16.mxu0 %v1569_v7  ;;  %v1600_v33 = vld [vmem:[#allocation8 + $0x70] sm:$0xff]   ;;  %v1602_v35 = vld [vmem:[#allocation8 + $0x78] sm:$0xff]   ;;  %v323_v40 = vld [vmem:[%s2576_s2] sm:$0x3]  ;;  %s1760_s25 = scalar_lea.vmem %s1759_s15, 1024  ;;  %p1761_p6 = scmp.lt.s32.totalorder %s2520_s11, %s1759_s15 }
  0x7e   : > { %v1601_v34 = vld [vmem:[#allocation8 + $0x30] sm:$0xff]   ;;  %v1603_v36 = vld [vmem:[#allocation8 + $0x38] sm:$0xff]   ;;  %v2092_v42 = vrot.slane %v323_v40, %v327_v39  ;;  %v2094_v43 = vrot.slane %v323_v40, %v331_v41  ;;  %p1756_p2 = pnand %p1755_p1, %p2011_p8  ;;  %p1762_p13 = scmp.lt.s32.totalorder %s1760_s25, %s1754_s27 }
  0x7f   : > { %1433 = vmatpush3.bf16.msra.mxu1 %v1591_v24 }
  0x80   : > { %446 = vmatpush1.bf16.msra.mxu0 %v1571_v8  ;;  %1434 = vmatprep.subr.bf16.mxu1 %v1592_v25  ;;  %p1757_p4 = pneg %p1756_p2  ;;  %p1763_p0 = por %p1762_p13, %p1761_p6 }
  0x81   : > { %447 = vmatprep.subr.bf16.mxu0 %v1572_v9 }
  0x82   : > { %p1764_p5 = pnand %p1763_p0, %p1757_p4 }
  0x83   : > { %1435 = vmatpush3.bf16.msra.mxu1 %v1593_v26 }
  0x84   : > { %448 = vmatpush1.bf16.msra.mxu0 %v1574_v10  ;;  %1436 = vmatprep.subr.bf16.mxu1 %v1594_v27 }
  0x85   : > { %449 = vmatprep.subr.bf16.mxu0 %v1575_v11 }
  0x87   : > { %1437 = vmatpush3.bf16.msra.mxu1 %v1595_v28 }
  0x88   : > { %450 = vmatpush1.bf16.msra.mxu0 %v1577_v12  ;;  %1438 = vmatprep.subr.bf16.mxu1 %v1596_v29 }
  0x89   : > { %451 = vmatprep.subr.bf16.mxu0 %v1578_v13 }
  0x8b   : > { %1439 = vmatpush3.bf16.msra.mxu1 %v1597_v30 }
  0x8c   : > { %452 = vmatpush1.bf16.msra.mxu0 %v1580_v14  ;;  %1440 = vmatprep.subr.bf16.mxu1 %v1598_v31 }
  0x8d   : > { %453 = vmatprep.subr.bf16.mxu0 %v1581_v15 }
  0x8f   : > { %1441 = vmatpush3.bf16.msra.mxu1 %v1599_v32 }
  0x90   : > { %454 = vmatpush1.bf16.msra.mxu0 %v1583_v16  ;;  %1442 = vmatprep.subr.bf16.mxu1 %v1600_v33 }
  0x93   : > { %472 = vmatmul.mubr.bf16.vlgmr.msra.gmra.mrb[0].mxu0 %v1584_v17  ;;  %1443 = vmatpush3.bf16.msra.mxu1 %v1601_v34 }
  0x94   : > { %481 = vmatprep.mubr.bf16.mxu0 %v1849_v0  ;;  %1444 = vmatprep.subr.bf16.mxu1 %v1602_v35 }
  0x97   : > { %1445 = vmatpush3.bf16.msra.mxu1 %v1603_v36 }
  0x9b   : > { %482 = vmatmul.mubr.bf16.gmra.mrb[4].mxu0 %v1585_v18 }
  0x9c   : > { %491 = vmatprep.mubr.bf16.mxu0 %v1849_v0 }
  0xa3   : > { %492 = vmatmul.mubr.bf16.gmra.mrb[8].mxu0 %v1586_v19 }
  0xa4   : > { %501 = vmatprep.mubr.bf16.mxu0 %v1849_v0 }
  0xab   : > { %502 = vmatmul.mubr.bf16.gmra.mrb[12].mxu0 %v1587_v20 }
 0x166   : > { %v473_v44 = vpop.f32.mrb[0].mxu0 }
 0x167   : > { %v474_v45 = vadd.f32 %v473_v44, %v2092_v42  ;;  %v475_v46 = vpop.f32.mrb[1].mxu0 }
 0x168   : > { %v477_v47 = vpop.f32.mrb[2].mxu0  ;;  %v476_v49 = vadd.f32 %v475_v46, %v2094_v43 }
 0x169   : > { %v2097_v48 = vmul.f32 0.70710677, %v474_v45  ;;  %v478_v50 = vadd.f32 %v477_v47, %v2092_v42  ;;  %v479_v51 = vpop.f32.mrb[3].mxu0  ;;  %v2151_v24 = vmul.f32 0.5, %v474_v45 }
 0x16a   : > { %v2104_v55 = vmul.f32 0.70710677, %v476_v49  ;;  %v2108_v59 = vadd.f32 %v479_v51, %v2094_v43  ;;  %v2157_v29 = vmul.f32 0.5, %v476_v49 }
 0x16b   : > { %v544_v52 = vand.u32 2147483647, %v2097_v48  ;;  %v2102_v53 = vmul.f32 0.70710677, %v478_v50  ;;  %v2166_v45 = vmul.f32 0.5, %v478_v50  ;;  %vm848_vm0 = vcmp.ge.f32.partialorder %v2097_v48, 0.0 }
 0x16c   : > { %v545_v62 = vand.u32 2147483647, %v2104_v55  ;;  %v2112_v2 = vmul.f32 0.70710677, %v2108_v59  ;;  %2598 = vst [vmem:[#allocation13_spill] sm:$0xff] %v2157_v29  ;;  %vm849_vm10 = vcmp.ge.f32.partialorder %v2104_v55, 0.0 }
 0x16d   : > { %v560_v54 = vmul.f32 0.3275911, %v544_v52  ;;  %v546_v56 = vand.u32 2147483647, %v2102_v53  ;;  %v752_v5 = vsub.f32 0.0, %v544_v52  ;;  %vm850_vm1 = vcmp.ge.f32.partialorder %v2102_v53, 0.0 }
 0x16e   : > { %v483_v60 = vpop.f32.mrb[4].mxu0  ;;  %v561_v7 = vmul.f32 0.3275911, %v545_v62  ;;  %v753_v10 = vsub.f32 0.0, %v545_v62  ;;  %v547_v14 = vand.u32 2147483647, %v2112_v2 }
 0x16f   : > { %v576_v57 = vadd.f32 1.0, %v560_v54  ;;  %v562_v58 = vmul.f32 0.3275911, %v546_v56  ;;  %v485_v61 = vpop.f32.mrb[5].mxu0  ;;  %v2115_v3 = vadd.f32 %v483_v60, %v2092_v42  ;;  %v768_v17 = vmul.f32 %v752_v5, %v544_v52 }
 0x170   : > { %v487_v0 = vpop.f32.mrb[6].mxu0  ;;  %v2118_v4 = vadd.f32 %v485_v61, %v2094_v43  ;;  %v754_v21 = vsub.f32 0.0, %v546_v56  ;;  %v769_v25 = vmul.f32 %v753_v10, %v545_v62  ;;  %v577_v30 = vadd.f32 1.0, %v561_v7 }
 0x171   : > { %1604 = vrcp.f32 %v576_v57  ;;  %v578_v63 = vadd.f32 1.0, %v562_v58  ;;  %v489_v1 = vpop.f32.mrb[7].mxu0  ;;  %v2121_v6 = vadd.f32 %v487_v0, %v2092_v42  ;;  %v2124_v8 = vmul.f32 0.70710677, %v2115_v3 }
 0x172   : > { %v2127_v9 = vadd.f32 %v489_v1, %v2094_v43  ;;  %v2130_v11 = vmul.f32 0.70710677, %v2118_v4  ;;  %v784_v35 = vmul.f32 1.442695, %v768_v17  ;;  %v755_v36 = vsub.f32 0.0, %v547_v14 }
 0x173   : > { %1606 = vrcp.f32 %v578_v63  ;;  %v2133_v12 = vmul.f32 0.70710677, %v2121_v6  ;;  %v2137_v15 = vand.u32 2147483647, %v2124_v8  ;;  %v770_v38 = vmul.f32 %v754_v21, %v546_v56  ;;  %v2602_v55 = vld [vmem:[#allocation13_spill] sm:$0xff] }
 0x174   : > { %v2140_v18 = vand.u32 2147483647, %v2130_v11  ;;  %v2149_v23 = vmul.f32 0.70710677, %v2127_v9  ;;  %v786_v44 = vmul.f32 1.442695, %v769_v25  ;;  %v771_v50 = vmul.f32 %v755_v36, %v547_v14 }
 0x175   : > { %v2143_v19 = vand.u32 2147483647, %v2133_v12  ;;  %v564_v22 = vmul.f32 0.3275911, %v2137_v15  ;;  %v563_v49 = vmul.f32 0.3275911, %v547_v14 }
 0x176   : > { %v493_v13 = vpop.f32.mrb[8].mxu0  ;;  %v565_v26 = vmul.f32 0.3275911, %v2140_v18  ;;  %v2160_v32 = vand.u32 2147483647, %v2149_v23  ;;  %v2190_v5 = vmul.f32 0.5, %v2108_v59 }
 0x177   : > { %v495_v16 = vpop.f32.mrb[9].mxu0  ;;  %v566_v27 = vmul.f32 0.3275911, %v2143_v19  ;;  %v580_v31 = vadd.f32 1.0, %v564_v22  ;;  %v2173_v52 = vadd.f32 %v493_v13, %v2092_v42  ;;  %v788_v60 = vmul.f32 1.442695, %v770_v38 }
 0x178   : > { %v2145_v20 = vpop.f32.mrb[10].mxu0  ;;  %v581_v37 = vadd.f32 1.0, %v565_v26  ;;  %v567_v40 = vmul.f32 0.3275911, %v2160_v32  ;;  %v2185_v62 = vadd.f32 %v495_v16, %v2094_v43  ;;  %2599 = vst [vmem:[#allocation14_spill] sm:$0xff] %v2190_v5  ;;  %v579_v7 = vadd.f32 1.0, %v563_v49 }
 0x179   : > { %v2162_v33 = vpop.f32.mrb[11].mxu0  ;;  %1608 = vrcp.f32 %v580_v31  ;;  %v582_v39 = vadd.f32 1.0, %v566_v27  ;;  %v2182_v61 = vmul.f32 0.70710677, %v2173_v52  ;;  %v756_v10 = vsub.f32 0.0, %v2137_v15 }
 0x17a   : > { %1610 = vrcp.f32 %v581_v37  ;;  %v583_v51 = vadd.f32 1.0, %v567_v40  ;;  %v790_v17 = vmul.f32 1.442695, %v771_v50  ;;  %v757_v16 = vsub.f32 0.0, %v2140_v18 }
 0x17b   : > { %v2155_v28 = vpop.eup %1604  ;;  %1612 = vrcp.f32 %v577_v30  ;;  %v2194_v13 = vand.u32 2147483647, %v2182_v61  ;;  %v2199_v21 = vmul.f32 0.70710677, %v2185_v62  ;;  %v2202_v22 = vmul.f32 0.5, %v2115_v3 }
 0x17c   : > { %v608_v34 = vmul.f32 1.0614054, %v2155_v28  ;;  %1614 = vpow2.f32 %v784_v35  ;;  %v2205_v59 = vmul.f32 0.5, %v2118_v4  ;;  %v2210_v30 = vmul.f32 0.5, %v2121_v6 }
 0x17d   : > { %v2170_v47 = vpop.eup %1606  ;;  %1616 = vrcp.f32 %v582_v39  ;;  %v568_v25 = vmul.f32 0.3275911, %v2194_v13  ;;  %v2213_v31 = vand.u32 2147483647, %v2199_v21  ;;  %v772_v3 = vmul.f32 %v756_v10, %v2137_v15 }
 0x17e   : > { %v624_v41 = vadd.f32 -1.4531521, %v608_v34  ;;  %v2168_v46 = vpop.f32.mrb[12].mxu0  ;;  %v610_v57 = vmul.f32 1.0614054, %v2170_v47  ;;  %1618 = vpow2.f32 %v786_v44  ;;  %v758_v35 = vsub.f32 0.0, %v2143_v19 }
 0x17f   : > { %v2175_v54 = vpop.f32.mrb[13].mxu0  ;;  %1620 = vrcp.f32 %v583_v51  ;;  %v584_v4 = vadd.f32 1.0, %v568_v25  ;;  %v773_v6 = vmul.f32 %v757_v16, %v2140_v18  ;;  %v569_v39 = vmul.f32 0.3275911, %v2213_v31 }
 0x180   : > { %v640_v56 = vmul.f32 %v2155_v28, %v624_v41  ;;  %v2179_v58 = vpop.f32.mrb[14].mxu0  ;;  %v626_v1 = vadd.f32 -1.4531521, %v610_v57  ;;  %1622 = vpow2.f32 %v788_v60  ;;  %v759_v44 = vsub.f32 0.0, %v2160_v32 }
 0x181   : > { %v2187_v63 = vpop.f32.mrb[15].mxu0  ;;  %1624 = vrcp.f32 %v579_v7  ;;  %v2231_v15 = vadd.f32 %v2145_v20, %v2092_v42  ;;  %v2236_v18 = vmul.f32 0.5, %v2127_v9  ;;  %v792_v50 = vmul.f32 1.442695, %v772_v3 }
 0x182   : > { %v656_v0 = vadd.f32 1.4214138, %v640_v56  ;;  %v642_v14 = vmul.f32 %v2170_v47, %v626_v1  ;;  %1626 = vrcp.f32 %v584_v4  ;;  %v585_v1 = vadd.f32 1.0, %v569_v39 }
 0x183   : > { %v2215_v34 = vpop.eup %1608  ;;  %1628 = vpow2.f32 %v790_v17  ;;  %v775_v25 = vmul.f32 %v759_v44, %v2160_v32  ;;  %vm852_vm2 = vcmp.ge.f32.partialorder %v2124_v8, 0.0  ;;  %vm853_vm3 = vcmp.ge.f32.partialorder %v2130_v11, 0.0 }
 0x184   : > { %v672_v26 = vmul.f32 %v2155_v28, %v656_v0  ;;  %v658_v27 = vadd.f32 1.4214138, %v642_v14  ;;  %v2219_v36 = vpop.eup %1610  ;;  %v612_v38 = vmul.f32 1.0614054, %v2215_v34  ;;  %v774_v0 = vmul.f32 %v758_v35, %v2143_v19 }
 0x185   : > { %v2225_v40 = vpop.eup %1612  ;;  %v613_v41 = vmul.f32 1.0614054, %v2219_v36  ;;  %v794_v14 = vmul.f32 1.442695, %v773_v6  ;;  %1630 = vrcp.f32 %v585_v1  ;;  %v760_v35 = vsub.f32 0.0, %v2194_v13 }
 0x186   : > { %v674_v37 = vmul.f32 %v2170_v47, %v658_v27  ;;  %v2233_v49 = vpop.eup %1614  ;;  %v688_v51 = vadd.f32 -0.28449672, %v672_v26  ;;  %v628_v56 = vadd.f32 -1.4531521, %v612_v38  ;;  %v2250_v26 = vmul.f32 0.70710677, %v2231_v15 }
 0x187   : > { %v2238_v57 = vpop.eup %1616  ;;  %v629_v60 = vadd.f32 -1.4531521, %v613_v41  ;;  %1632 = vpow2.f32 %v792_v50  ;;  %v796_v44 = vmul.f32 1.442695, %v774_v0  ;;  %v798_v1 = vmul.f32 1.442695, %v775_v25 }
 0x188   : > { %v2241_v7 = vpop.eup %1618  ;;  %v690_v10 = vadd.f32 -0.28449672, %v674_v37  ;;  %v644_v20 = vmul.f32 %v2215_v34, %v628_v56  ;;  %v614_v16 = vmul.f32 1.0614054, %v2238_v57  ;;  %v704_v19 = vmul.f32 %v2155_v28, %v688_v51 }
 0x189   : > { %2600 = vst [vmem:[#allocation15_spill] sm:$0xff] %v2241_v7  ;;  %v2245_v17 = vpop.eup %1620  ;;  %v645_v9 = vmul.f32 %v2219_v36, %v629_v60  ;;  %v2256_v6 = vand.u32 2147483647, %v2250_v26  ;;  %1634 = vpow2.f32 %v794_v14  ;;  %vm854_vm4 = vcmp.ge.f32.partialorder %v2133_v12, 0.0 }
 0x18a   : > { %v660_v27 = vadd.f32 1.4214138, %v644_v20  ;;  %v630_v3 = vadd.f32 -1.4531521, %v614_v16  ;;  %v1623_v4 = vpop.eup %1622  ;;  %v615_v38 = vmul.f32 1.0614054, %v2245_v17  ;;  %v706_v32 = vmul.f32 %v2170_v47, %v690_v10 }
 0x18b   : > { %v661_v37 = vadd.f32 1.4214138, %v645_v9  ;;  %v2261_v51 = vpop.eup %1624  ;;  %v570_v50 = vmul.f32 0.3275911, %v2256_v6  ;;  %v720_v20 = vadd.f32 0.2548296, %v704_v19  ;;  %1636 = vpow2.f32 %v796_v44 }
 0x18c   : > { %v676_v39 = vmul.f32 %v2215_v34, %v660_v27  ;;  %v646_v41 = vmul.f32 %v2238_v57, %v630_v3  ;;  %v631_v60 = vadd.f32 -1.4531521, %v615_v38  ;;  %v2265_v5 = vpop.eup %1626  ;;  %v776_v3 = vmul.f32 %v760_v35, %v2194_v13 }
 0x18d   : > { %v677_v56 = vmul.f32 %v2219_v36, %v661_v37  ;;  %v586_v0 = vadd.f32 1.0, %v570_v50  ;;  %v2269_v29 = vpop.eup %1628  ;;  %v722_v7 = vadd.f32 0.2548296, %v706_v32  ;;  %1638 = vpow2.f32 %v798_v1 }
 0x18e   : > { %v692_v16 = vadd.f32 -0.28449672, %v676_v39  ;;  %v662_v9 = vadd.f32 1.4214138, %v646_v41  ;;  %v647_v27 = vmul.f32 %v2245_v17, %v631_v60  ;;  %v616_v38 = vmul.f32 1.0614054, %v2265_v5 }
 0x18f   : > { %v693_v10 = vadd.f32 -0.28449672, %v677_v56  ;;  %v736_v39 = vmul.f32 %v2155_v28, %v720_v20  ;;  %1640 = vrcp.f32 %v586_v0  ;;  %v2276_v13 = vpop.eup %1630  ;;  %v800_v50 = vmul.f32 1.442695, %v776_v3 }
 0x190   : > { %v708_v37 = vmul.f32 %v2215_v34, %v692_v16  ;;  %v678_v25 = vmul.f32 %v2238_v57, %v662_v9  ;;  %v663_v14 = vadd.f32 1.4214138, %v647_v27  ;;  %v632_v60 = vadd.f32 -1.4531521, %v616_v38 }
 0x191   : > { %v709_v19 = vmul.f32 %v2219_v36, %v693_v10  ;;  %v738_v44 = vmul.f32 %v2170_v47, %v722_v7  ;;  %v2282_v1 = vmul.f32 0.5, %v2173_v52  ;;  %v617_v9 = vmul.f32 1.0614054, %v2276_v13  ;;  %v1633_v28 = vpop.eup %1632 }
 0x192   : > { %v724_v41 = vadd.f32 0.2548296, %v708_v37  ;;  %v694_v56 = vadd.f32 -0.28449672, %v678_v25  ;;  %v679_v32 = vmul.f32 %v2245_v17, %v663_v14  ;;  %v648_v27 = vmul.f32 %v2265_v5, %v632_v60 }
 0x193   : > { %v725_v35 = vadd.f32 0.2548296, %v709_v19  ;;  %v761_v0 = vsub.f32 0.0, %v2213_v31  ;;  %v2289_v37 = vmul.f32 %v2233_v49, %v736_v39  ;;  %v633_v3 = vadd.f32 -1.4531521, %v617_v9 }
 0x194   : > { %v710_v16 = vmul.f32 %v2238_v57, %v694_v56  ;;  %v740_v20 = vmul.f32 %v2215_v34, %v724_v41  ;;  %v695_v10 = vadd.f32 -0.28449672, %v679_v32  ;;  %v664_v25 = vadd.f32 1.4214138, %v648_v27  ;;  %v1635_v34 = vpop.eup %1634 }
 0x195   : > { %v741_v47 = vmul.f32 %v2219_v36, %v725_v35  ;;  %1642 = vpow2.f32 %v800_v50  ;;  %v2295_v19 = vadd.f32 %v2162_v33, %v2094_v43  ;;  %v818_v14 = vmul.f32 %v1623_v4, %v738_v44  ;;  %v1637_v32 = vpop.eup %1636 }
 0x196   : > { %v726_v7 = vadd.f32 0.2548296, %v710_v16  ;;  %v711_v52 = vmul.f32 %v2245_v17, %v695_v10  ;;  %v649_v41 = vmul.f32 %v2276_v13, %v633_v3  ;;  %v762_v49 = vsub.f32 0.0, %v2256_v6 }
 0x197   : > { %v820_v39 = vmul.f32 %v1633_v28, %v740_v20  ;;  %v680_v56 = vmul.f32 %v2265_v5, %v664_v25  ;;  %v777_v35 = vmul.f32 %v761_v0, %v2213_v31  ;;  %v832_v60 = vsub.f32 1.0, %v2289_v37  ;;  %v1639_v50 = vpop.eup %1638 }
 0x198   : > { %v742_v38 = vmul.f32 %v2238_v57, %v726_v7  ;;  %v727_v36 = vadd.f32 0.2548296, %v711_v52  ;;  %v821_v33 = vmul.f32 %v1635_v34, %v741_v47  ;;  %v2305_v4 = vmul.f32 0.5, %v2185_v62 }
 0x199   : > { %v665_v57 = vadd.f32 1.4214138, %v649_v41  ;;  %v696_v9 = vadd.f32 -0.28449672, %v680_v56  ;;  %v2310_v28 = vmul.f32 0.70710677, %v2295_v19  ;;  %v2312_v31 = vpop.eup %1640  ;;  %v778_v62 = vmul.f32 %v762_v49, %v2256_v6 }
 0x19a   : > { %v822_v44 = vmul.f32 %v1637_v32, %v742_v38  ;;  %v743_v16 = vmul.f32 %v2245_v17, %v727_v36  ;;  %v834_v20 = vsub.f32 1.0, %v818_v14  ;;  %v2319_v27 = vadd.f32 %v2168_v46, %v2092_v42 }
 0x19b   : > { %v681_v10 = vmul.f32 %v2276_v13, %v665_v57  ;;  %v836_v0 = vsub.f32 1.0, %v820_v39  ;;  %v712_v37 = vmul.f32 %v2265_v5, %v696_v9  ;;  %v802_v47 = vmul.f32 1.442695, %v777_v35 }
 0x19c   : > { %v823_v17 = vmul.f32 %v1639_v50, %v743_v16  ;;  %v837_v7 = vsub.f32 1.0, %v821_v33  ;;  %v2325_v52 = vmul.f32 0.5, %v2231_v15  ;;  %v618_v6 = vmul.f32 1.0614054, %v2312_v31 }
 0x19d   : > { %v697_v3 = vadd.f32 -0.28449672, %v681_v10  ;;  %v864_v25 = vsub.f32 0.0, %v832_v60  ;;  %v838_v34 = vsub.f32 1.0, %v822_v44  ;;  %vm855_vm5 = vcmp.ge.f32.partialorder %v2149_v23, 0.0 }
 0x19e   : > { %v728_v46 = vadd.f32 0.2548296, %v712_v37  ;;  %v555_v14 = vand.u32 2147483647, %v2310_v28  ;;  %v866_v38 = vsub.f32 0.0, %v834_v20  ;;  %v839_v41 = vsub.f32 1.0, %v823_v17 }
 0x19f   : > { %v634_v49 = vadd.f32 -1.4531521, %v618_v6  ;;  %v804_v39 = vmul.f32 1.442695, %v778_v62  ;;  %v1643_v36 = vpop.eup %1642  ;;  %v868_v56 = vsub.f32 0.0, %v836_v0  ;;  %v713_v15 = vmul.f32 %v2276_v13, %v697_v3 }
 0x1a0   : > { %v744_v35 = vmul.f32 %v2265_v5, %v728_v46  ;;  %v571_v32 = vmul.f32 0.3275911, %v555_v14  ;;  %v869_v33 = vsub.f32 0.0, %v837_v7  ;;  %1644 = vpow2.f32 %v802_v47 }
 0x1a1   : > { %v650_v57 = vmul.f32 %v2312_v31, %v634_v49  ;;  %v2335_v50 = vadd.f32 %v2175_v54, %v2094_v43  ;;  %v880_v44 = vsel %vm848_vm0, %v832_v60, %v864_v25  ;;  %v870_v16 = vsub.f32 0.0, %v838_v34 }
 0x1a2   : > { %v824_v9 = vmul.f32 %v1643_v36, %v744_v35  ;;  %v587_v10 = vadd.f32 1.0, %v571_v32  ;;  %v882_v5 = vsel %vm850_vm1, %v834_v20, %v866_v38  ;;  %v871_v62 = vsub.f32 0.0, %v839_v41 }
 0x1a3   : > { %v666_v17 = vadd.f32 1.4214138, %v650_v57  ;;  %1646 = vpow2.f32 %v804_v39  ;;  %v884_v37 = vsel %vm852_vm2, %v836_v0, %v868_v56  ;;  %v729_v47 = vadd.f32 0.2548296, %v713_v15 }
 0x1a4   : > { %1648 = vrcp.f32 %v587_v10  ;;  %v2344_v54 = vmul.f32 0.70710677, %v2319_v27  ;;  %v896_v3 = vadd.f32 1.0, %v880_v44  ;;  %v885_v48 = vsel %vm853_vm3, %v837_v7, %v869_v33 }
 0x1a5   : > { %vm856_vm6 = vcmp.ge.f32.partialorder %v2182_v61, 0.0  ;;  %v682_v53 = vmul.f32 %v2312_v31, %v666_v17  ;;  %v763_v60 = vsub.f32 0.0, %v555_v14  ;;  %v886_v20 = vsel %vm854_vm4, %v838_v34, %v870_v16 }
 0x1a6   : > { %v840_v6 = vsub.f32 1.0, %v824_v9  ;;  %v556_v8 = vand.u32 2147483647, %v2344_v54  ;;  %v2354_v0 = vmul.f32 0.70710677, %v2335_v50  ;;  %v898_v25 = vadd.f32 1.0, %v882_v5 }
 0x1a7   : > { %v900_v46 = vadd.f32 1.0, %v884_v37  ;;  %v887_v11 = vsel %vm855_vm5, %v839_v41, %v871_v62  ;;  %v698_v7 = vadd.f32 -0.28449672, %v682_v53  ;;  %v901_v38 = vadd.f32 1.0, %v885_v48 }
 0x1a8   : > { %v745_v49 = vmul.f32 %v2276_v13, %v729_v47  ;;  %v572_v39 = vmul.f32 0.3275911, %v556_v8  ;;  %v2360_v36 = vand.u32 2147483647, %v2354_v0  ;;  %v902_v12 = vadd.f32 1.0, %v886_v20 }
 0x1a9   : > { %v714_v34 = vmul.f32 %v2312_v31, %v698_v7  ;;  %v779_v56 = vmul.f32 %v763_v60, %v555_v14  ;;  %v2365_v35 = vadd.f32 %v2179_v58, %v2092_v42  ;;  %v903_v15 = vadd.f32 1.0, %v887_v11 }
 0x1aa   : > { %v872_v32 = vsub.f32 0.0, %v840_v6  ;;  %v588_v23 = vadd.f32 1.0, %v572_v39  ;;  %v573_v41 = vmul.f32 0.3275911, %v2360_v36  ;;  %v1645_v33 = vpop.eup %1644  ;;  %v2369_v13 = vmul.f32 %v896_v3, %v2151_v24 }
 0x1ab   : > { %v2372_v57 = vmul.f32 %v898_v25, %v2166_v45  ;;  %v2375_v44 = vmul.f32 %v900_v46, %v2202_v22  ;;  %v730_v14 = vadd.f32 0.2548296, %v714_v34  ;;  %v2378_v16 = vmul.f32 %v901_v38, %v2205_v59 }
 0x1ac   : > { %v2380_v42 = vmul.f32 %v1645_v33, %v745_v49  ;;  %vm858_vm7 = vcmp.ge.f32.partialorder %v2250_v26, 0.0  ;;  %1650 = vrcp.f32 %v588_v23  ;;  %v589_v58 = vadd.f32 1.0, %v573_v41 }
 0x1ad   : > { %v1647_v9 = vpop.eup %1646  ;;  %v746_v24 = vmul.f32 %v2312_v31, %v730_v14  ;;  %v806_v10 = vmul.f32 1.442695, %v779_v56  ;;  %v2385_v45 = vmul.f32 0.70710677, %v2365_v35  ;;  %v2389_v22 = vadd.f32 %v2187_v63, %v2094_v43 }
 0x1ae   : > { %v2391_v5 = vpop.eup %1648  ;;  %v2394_v59 = vmul.f32 %v902_v12, %v2210_v30  ;;  %v2397_v62 = vmul.f32 %v903_v15, %v2236_v18  ;;  %v888_v17 = vsel %vm856_vm6, %v840_v6, %v872_v32  ;;  %v609_v31 = vmul.f32 1.0614054, %v2225_v40 }
 0x1af   : > { %v826_v37 = vmul.f32 %v1647_v9, %v746_v24  ;;  %v619_v47 = vmul.f32 1.0614054, %v2391_v5  ;;  %1652 = vrcp.f32 %v589_v58  ;;  %v611_v43 = vmul.f32 1.0614054, %v2261_v51 }
 0x1b0   : > { %v841_v63 = vsub.f32 1.0, %v2380_v42  ;;  %v764_v3 = vsub.f32 0.0, %v556_v8  ;;  %v558_v30 = vand.u32 2147483647, %v2385_v45  ;;  %v2407_v48 = vmul.f32 0.70710677, %v2389_v22 }
 0x1b1   : > { %v842_v18 = vsub.f32 1.0, %v826_v37  ;;  %v635_v53 = vadd.f32 -1.4531521, %v619_v47  ;;  %1654 = vpow2.f32 %v806_v10  ;;  %v625_v61 = vadd.f32 -1.4531521, %v609_v31 }
 0x1b2   : > { %v904_v60 = vadd.f32 1.0, %v888_v17  ;;  %v765_v20 = vsub.f32 0.0, %v2360_v36  ;;  %v574_v6 = vmul.f32 0.3275911, %v558_v30  ;;  %v2411_v25 = vand.u32 2147483647, %v2407_v48 }
 0x1b3   : > { %v874_v46 = vsub.f32 0.0, %v842_v18  ;;  %v651_v11 = vmul.f32 %v2391_v5, %v635_v53  ;;  %v627_v7 = vadd.f32 -1.4531521, %v611_v43  ;;  %v641_v38 = vmul.f32 %v2225_v40, %v625_v61 }
 0x1b4   : > { %v873_v49 = vsub.f32 0.0, %v841_v63  ;;  %v780_v39 = vmul.f32 %v764_v3, %v556_v8  ;;  %v590_v12 = vadd.f32 1.0, %v574_v6  ;;  %v575_v34 = vmul.f32 0.3275911, %v2411_v25 }
 0x1b5   : > { %v890_v56 = vsel %vm858_vm7, %v842_v18, %v874_v46  ;;  %v667_v15 = vadd.f32 1.4214138, %v651_v11  ;;  %v643_v32 = vmul.f32 %v2261_v51, %v627_v7  ;;  %v657_v23 = vadd.f32 1.4214138, %v641_v38 }
 0x1b6   : > { %v2421_v41 = vpop.eup %1650  ;;  %v2424_v33 = vmul.f32 %v904_v60, %v2282_v1  ;;  %vm857_vm8 = vcmp.ge.f32.partialorder %v2199_v21, 0.0  ;;  %v906_v14 = vadd.f32 1.0, %v890_v56  ;;  %1656 = vrcp.f32 %v590_v12 }
 0x1b7   : > { %v591_v8 = vadd.f32 1.0, %v575_v34  ;;  %v683_v58 = vmul.f32 %v2391_v5, %v667_v15  ;;  %v620_v9 = vmul.f32 1.0614054, %v2421_v41  ;;  %v781_v26 = vmul.f32 %v765_v20, %v2360_v36 }
 0x1b8   : > { %v659_v24 = vadd.f32 1.4214138, %v643_v32  ;;  %v2431_v10 = vmul.f32 %v906_v14, %v2325_v52  ;;  %v808_v17 = vmul.f32 1.442695, %v780_v39  ;;  %v673_v31 = vmul.f32 %v2225_v40, %v657_v23 }
 0x1b9   : > { %v928_v1 = vpack.c.bf16 %v2372_v57, %v2369_v13  ;;  %v2436_v37 = vpop.eup %1652  ;;  %v699_v47 = vadd.f32 -0.28449672, %v683_v58  ;;  %v636_v43 = vadd.f32 -1.4531521, %v620_v9  ;;  %v766_v3 = vsub.f32 0.0, %v558_v30 }
 0x1ba   : > { %1658 = vrcp.f32 %v591_v8  ;;  %v621_v18 = vmul.f32 1.0614054, %v2436_v37  ;;  %v675_v36 = vmul.f32 %v2261_v51, %v659_v24  ;;  %v689_v53 = vadd.f32 -0.28449672, %v673_v31 }
 0x1bb   : > { %v931_v52 = vpack.c.bf16 %v2397_v62, %v2378_v16  ;;  %v1655_v61 = vpop.eup %1654  ;;  %v715_v60 = vmul.f32 %v2391_v5, %v699_v47  ;;  %v652_v20 = vmul.f32 %v2421_v41, %v636_v43  ;;  %v810_v6 = vmul.f32 1.442695, %v781_v26  ;;  %v2601_v43 = vld [vmem:[#allocation15_spill] sm:$0xff] }
 0x1bc   : > { %v930_v46 = vpack.c.bf16 %v2394_v59, %v2375_v44  ;;  %v637_v11 = vadd.f32 -1.4531521, %v621_v18  ;;  %v691_v7 = vadd.f32 -0.28449672, %v675_v36  ;;  %v705_v38 = vmul.f32 %v2225_v40, %v689_v53 }
 0x1bd   : > { %v932_v39 = vpack.c.bf16 %v2431_v10, %v2424_v33  ;;  %v523_v12 = vmul.f32 0.5, %v2295_v19  ;;  %v731_v34 = vadd.f32 0.2548296, %v715_v60  ;;  %v668_v56 = vadd.f32 1.4214138, %v652_v20 }
 0x1be   : > { %v782_v15 = vmul.f32 %v766_v3, %v558_v30  ;;  %vm859_vm9 = vcmp.ge.f32.partialorder %v2310_v28, 0.0  ;;  %1660 = vpow2.f32 %v808_v17  ;;  %v653_v32 = vmul.f32 %v2436_v37, %v637_v11 }
 0x1bf   : > { %v707_v23 = vmul.f32 %v2261_v51, %v691_v7  ;;  %v721_v14 = vadd.f32 0.2548296, %v705_v38  ;;  %v889_v8 = vsel %vm857_vm8, %v841_v63, %v873_v49  ;;  %v747_v58 = vmul.f32 %v2391_v5, %v731_v34 }
 0x1c0   : > { %v684_v19 = vmul.f32 %v2421_v41, %v668_v56  ;;  %v767_v9 = vsub.f32 0.0, %v2411_v25  ;;  %v2460_v30 = vpop.eup %1656  ;;  %v669_v26 = vadd.f32 1.4214138, %v653_v32  ;;  %1662 = vpow2.f32 %v810_v6 }
 0x1c1   : > { %v723_v24 = vadd.f32 0.2548296, %v707_v23  ;;  %v737_v17 = vmul.f32 %v2225_v40, %v721_v14  ;;  %vm851_vm11 = vcmp.ge.f32.partialorder %v2112_v2, 0.0  ;;  %v827_v42 = vmul.f32 %v1655_v61, %v747_v58 }
 0x1c2   : > { %v700_v21 = vadd.f32 -0.28449672, %v684_v19  ;;  %v622_v63 = vmul.f32 1.0614054, %v2460_v30  ;;  %v812_v5 = vmul.f32 1.442695, %v782_v15  ;;  %v685_v31 = vmul.f32 %v2436_v37, %v669_v26 }
 0x1c3   : > { %v905_v49 = vadd.f32 1.0, %v889_v8  ;;  %v739_v47 = vmul.f32 %v2261_v51, %v723_v24  ;;  %v817_v3 = vmul.f32 %v2601_v43, %v737_v17  ;;  %v843_v36 = vsub.f32 1.0, %v827_v42 }
 0x1c4   : > { %v1659_v18 = vpop.eup %1658  ;;  %v716_v53 = vmul.f32 %v2421_v41, %v700_v21  ;;  %v638_v60 = vadd.f32 -1.4531521, %v622_v63  ;;  %v783_v40 = vmul.f32 %v767_v9, %v2411_v25  ;;  %v701_v20 = vadd.f32 -0.28449672, %v685_v31 }
 0x1c5   : > { %v623_v61 = vmul.f32 1.0614054, %v1659_v18  ;;  %v819_v6 = vmul.f32 %v2269_v29, %v739_v47  ;;  %v833_v11 = vsub.f32 1.0, %v817_v3  ;;  %v875_v7 = vsub.f32 0.0, %v843_v36 }
 0x1c6   : > { %v732_v38 = vadd.f32 0.2548296, %v716_v53  ;;  %v654_v34 = vmul.f32 %v2460_v30, %v638_v60  ;;  %1664 = vpow2.f32 %v812_v5  ;;  %v717_v51 = vmul.f32 %v2436_v37, %v701_v20  ;;  %v2603_v20 = vld [vmem:[#allocation14_spill] sm:$0xff] }
 0x1c7   : > { %v639_v56 = vadd.f32 -1.4531521, %v623_v61  ;;  %v835_v15 = vsub.f32 1.0, %v819_v6  ;;  %v865_v32 = vsub.f32 0.0, %v833_v11  ;;  %v891_v23 = vsel %vm859_vm9, %v843_v36, %v875_v7 }
 0x1c8   : > { %v748_v25 = vmul.f32 %v2421_v41, %v732_v38  ;;  %v670_v14 = vadd.f32 1.4214138, %v654_v34  ;;  %v814_v8 = vmul.f32 1.442695, %v783_v40  ;;  %v1661_v58 = vpop.eup %1660  ;;  %v907_v29 = vadd.f32 1.0, %v891_v23 }
 0x1c9   : > { %v733_v19 = vadd.f32 0.2548296, %v717_v51  ;;  %v655_v9 = vmul.f32 %v1659_v18, %v639_v56  ;;  %v867_v26 = vsub.f32 0.0, %v835_v15  ;;  %v921_v24 = vmul.f32 %v905_v49, %v2305_v4 }
 0x1ca   : > { %v828_v17 = vmul.f32 %v1661_v58, %v748_v25  ;;  %v686_v42 = vmul.f32 %v2460_v30, %v670_v14  ;;  %v881_v21 = vsel %vm849_vm10, %v833_v11, %v865_v32  ;;  %v1663_v63 = vpop.eup %1662  ;;  %v923_v28 = vmul.f32 %v907_v29, %v523_v12 }
 0x1cb   : > { %v749_v5 = vmul.f32 %v2436_v37, %v733_v19  ;;  %v671_v41 = vadd.f32 1.4214138, %v655_v9  ;;  %v883_v31 = vsel %vm851_vm11, %v835_v15, %v867_v26  ;;  %1666 = vpow2.f32 %v814_v8 }
 0x1cc   : > { %v702_v47 = vadd.f32 -0.28449672, %v686_v42  ;;  %v897_v43 = vadd.f32 1.0, %v881_v21  ;;  %v899_v3 = vadd.f32 1.0, %v883_v31  ;;  %v933_v49 = vpack.c.bf16 %v923_v28, %v921_v24 }
 0x1cd   : > { %v829_v36 = vmul.f32 %v1663_v63, %v749_v5  ;;  %v687_v4 = vmul.f32 %v1659_v18, %v671_v41  ;;  %v844_v53 = vsub.f32 1.0, %v828_v17  ;;  %vm860_vm12 = vcmp.ge.f32.partialorder %v2344_v54, 0.0 }
 0x1ce   : > { %v718_v60 = vmul.f32 %v2460_v30, %v702_v47  ;;  %v913_v40 = vmul.f32 %v897_v43, %v2602_v55  ;;  %v915_v12 = vmul.f32 %v899_v3, %v2603_v20  ;;  %vm861_vm13 = vcmp.ge.f32.partialorder %v2354_v0, 0.0 }
 0x1cf   : > { %v703_v61 = vadd.f32 -0.28449672, %v687_v4  ;;  %v845_v2 = vsub.f32 1.0, %v829_v36  ;;  %v876_v38 = vsub.f32 0.0, %v844_v53  ;;  %vm862_vm14 = vcmp.ge.f32.partialorder %v2385_v45, 0.0 }
 0x1d0   : > { %v1665_v37 = vpop.eup %1664  ;;  %v734_v6 = vadd.f32 0.2548296, %v718_v60  ;;  %v929_v11 = vpack.c.bf16 %v915_v12, %v913_v40  ;;  %v524_v16 = vmul.f32 0.5, %v2319_v27  ;;  %v526_v62 = vmul.f32 0.5, %v2365_v35 }
 0x1d1   : > { %v719_v7 = vmul.f32 %v1659_v18, %v703_v61  ;;  %v877_v15 = vsub.f32 0.0, %v845_v2  ;;  %v892_v25 = vsel %vm860_vm12, %v844_v53, %v876_v38  ;;  %vm863_vm15 = vcmp.ge.f32.partialorder %v2407_v48, 0.0 }
 0x1d2   : > { %v750_v34 = vmul.f32 %v2460_v30, %v734_v6  ;;  %1104 = vmatprep.mubr.bf16.mxu1 %v929_v11  ;;  %v908_v58 = vadd.f32 1.0, %v892_v25  ;;  %v525_v45 = vmul.f32 0.5, %v2335_v50  ;;  %v527_v9 = vmul.f32 0.5, %v2389_v22  ;;  %v1383_v50 = vld [vmem:[%s2578_s4] ss:$0 sm:$0xff] }
 0x1d3   : > { %v735_v51 = vadd.f32 0.2548296, %v719_v7  ;;  %1105 = vmatmul.mubr.bf16.vlgmr.msra.gmra.mrb[0].mxu1 %v928_v1  ;;  %v893_v29 = vsel %vm861_vm13, %v845_v2, %v877_v15 }
 0x1d4   : > { %v830_v56 = vmul.f32 %v1665_v37, %v750_v34  ;;  %1112 = vmatprep.mubr.bf16.mxu1 %v931_v52  ;;  %v909_v52 = vadd.f32 1.0, %v893_v29  ;;  %v924_v0 = vmul.f32 %v908_v58, %v524_v16 }
 0x1d5   : > { %v751_v32 = vmul.f32 %v1659_v18, %v735_v51  ;;  %v1667_v23 = vpop.eup %1666 }
 0x1d6   : > { %v846_v14 = vsub.f32 1.0, %v830_v56  ;;  %v925_v35 = vmul.f32 %v909_v52, %v525_v45 }
 0x1d7   : > { %v831_v8 = vmul.f32 %v1667_v23, %v751_v32 }
 0x1d8   : > { %v878_v30 = vsub.f32 0.0, %v846_v14 }
 0x1d9   : > { %v847_v13 = vsub.f32 1.0, %v831_v8 }
 0x1da   : > { %v894_v57 = vsel %vm862_vm14, %v846_v14, %v878_v30 }
 0x1db   : > { %v910_v54 = vadd.f32 1.0, %v894_v57  ;;  %v879_v1 = vsub.f32 0.0, %v847_v13  ;;  %1113 = vmatmul.mubr.bf16.gmra.mrb[4].mxu1 %v930_v46 }
 0x1dc   : > { %1120 = vmatprep.mubr.bf16.mxu1 %v933_v49 }
 0x1dd   : > { %v926_v18 = vmul.f32 %v910_v54, %v526_v62  ;;  %v895_v19 = vsel %vm863_vm15, %v847_v13, %v879_v1 }
 0x1de   : > { %v911_v27 = vadd.f32 1.0, %v895_v19 }
 0x1df   : > { %v934_v26 = vpack.c.bf16 %v926_v18, %v924_v0 }
 0x1e0   : > { %v927_v24 = vmul.f32 %v911_v27, %v527_v9 }
 0x1e2   : > { %v935_v17 = vpack.c.bf16 %v927_v24, %v925_v35 }
 0x1e3   : > { %1121 = vmatmul.mubr.bf16.gmra.mrb[8].mxu1 %v932_v39 }
 0x1e4   : > { %1128 = vmatprep.mubr.bf16.mxu1 %v935_v17 }
 0x1eb   : > { %1129 = vmatmul.mubr.bf16.gmra.mrb[12].mxu1 %v934_v26 }
 0x2a6   : > { %v1446_v44 = vpop.f32.mrb[0].mxu1 }
 0x2a7   : > { %v1447_v59 = vpop.f32.mrb[1].mxu1 }
 0x2a8   : > { %v1448_v48 = vadd.f32 %v1447_v59, %v1446_v44  ;;  %v1449_v46 = vpop.f32.mrb[2].mxu1 }
 0x2a9   : > { %v1450_v22 = vpop.f32.mrb[3].mxu1 }
 0x2aa   : > { %v1451_v42 = vadd.f32 %v1450_v22, %v1449_v46  ;;  %v1171_v21 = vadd.f32 %v1448_v48, %v1383_v50 }
 0x2ac   : > { %v1172_v63 = vadd.f32 %v1451_v42, %v1383_v50 }
 0x2ae   : > { %v1410_v28 = vpack.c.bf16 %v1172_v63, %v1171_v21  ;;  %v1452_v5 = vpop.f32.mrb[4].mxu1 }
 0x2af   : > { %v1453_v41 = vpop.f32.mrb[5].mxu1 }
 0x2b0   : > { %1411 = vst [vmem:[%s2513_s9] sm:$0xff] %v1410_v28   ;;  %v1454_v33 = vadd.f32 %v1453_v41, %v1452_v5  ;;  %v1455_v10 = vpop.f32.mrb[6].mxu1 }
 0x2b1   : > { %v1456_v39 = vpop.f32.mrb[7].mxu1 }
 0x2b2   : > { %v1457_v31 = vadd.f32 %v1456_v39, %v1455_v10  ;;  %v1173_v47 = vadd.f32 %v1454_v33, %v1383_v50 }
 0x2b4   : > { %v1174_v43 = vadd.f32 %v1457_v31, %v1383_v50 }
 0x2b6   : > { %v1415_v3 = vpack.c.bf16 %v1174_v43, %v1173_v47  ;;  %v1458_v36 = vpop.f32.mrb[8].mxu1 }
 0x2b7   : > { %v1459_v4 = vpop.f32.mrb[9].mxu1 }
 0x2b8   : > { %1427 = vst [vmem:[%s2513_s9 + $0x8] sm:$0xff] %v1415_v3   ;;  %v1460_v49 = vadd.f32 %v1459_v4, %v1458_v36  ;;  %v1461_v53 = vpop.f32.mrb[10].mxu1 }
 0x2b9   : > { %v1462_v60 = vpop.f32.mrb[11].mxu1 }
 0x2ba   : > { %v1463_v55 = vadd.f32 %v1462_v60, %v1461_v53  ;;  %v1175_v40 = vadd.f32 %v1460_v49, %v1383_v50 }
 0x2bc   : > { %v1176_v20 = vadd.f32 %v1463_v55, %v1383_v50 }
 0x2be   : > { %v1420_v12 = vpack.c.bf16 %v1176_v20, %v1175_v40  ;;  %v1464_v61 = vpop.f32.mrb[12].mxu1 }
 0x2bf   : > { %v1465_v37 = vpop.f32.mrb[13].mxu1 }
 0x2c0   : > { %1428 = vst [vmem:[%s2513_s9 + $0x10] sm:$0xff] %v1420_v12   ;;  %v1466_v6 = vadd.f32 %v1465_v37, %v1464_v61  ;;  %v1467_v11 = vpop.f32.mrb[14].mxu1 }
 0x2c1   : > { %v1468_v2 = vpop.f32.mrb[15].mxu1 }
 0x2c2   : > { %v1469_v7 = vadd.f32 %v1468_v2, %v1467_v11  ;;  %v1177_v38 = vadd.f32 %v1466_v6, %v1383_v50 }
 0x2c4   : > { %v1178_v34 = vadd.f32 %v1469_v7, %v1383_v50 }
 0x2c6   : > { %v1425_v51 = vpack.c.bf16 %v1178_v34, %v1177_v38 }
 0x2c8   : > { %1429 = vst [vmem:[%s2513_s9 + $0x18] sm:$0xff] %v1425_v51  }
 0x2c9   : > { %1767 = shalt.err (!%p1764_p5)
}
 0x2ca   : > { %s1768_s26 = scalar_lea.hbm %s2525_s7, 512  ;;  %s1772_s6 = scalar_lea.hbm %s2579_s5, 2048 }
 0x2cb   : > { %p1769_p9 = scmp.ne.s32.totalorder %s2525_s7, %s1768_s26  ;;  %p1773_p3 = scmp.lt.u32.totalorder %s2525_s7, %s2579_s5 }
 0x2cc   : > { %p1774_p7 = scmp.lt.u32.totalorder %s1772_s6, %s1768_s26  ;;  %p1776_p1 = scmp.lt.u32.totalorder %s1768_s26, %s2525_s7 }
 0x2cd   : > { %p1770_p12 = pnand %p1769_p9, %p2011_p8 }
 0x2ce   : > { %p1775_p10 = por %p1774_p7, %p1773_p3 }
 0x2cf   : > { %p1771_p11 = pneg %p1770_p12 }
 0x2d0   : > { %p1777_p2 = por %p1776_p1, %p1775_p10 }
 0x2d2   : > { %p1778_p4 = pnand %p1777_p2, %p1771_p11 }
 0x2d4   : > { %1781 = shalt.err (!%p1778_p4)
}
 0x2d5   : > { %s1851_s10 = smov 64   ;;  %s1852_s16 = smov 4  }
 0x2d6   : > { %1480 = dma.vmem_to_hbm [thread:$0]  (%p2011_p8), %s2520_s11, 512, %s2525_s7, %s1220_s14, %s1851_s10, %s1851_s10, %s1852_s16  }
 0x2d7 PF: > { %p1502_p6 = scmp.ge.s32.totalorder %s1840_s23, 2  ;;  %s1248_s27 = sand.u32 1, %s1820_s18  }
 0x2d8   : > { %p2604_p13 = scmp.ne.s32.totalorder %s2588_s29, 0  ;;  %s1249_s21 = scalar_lea.sflag [#allocation5], %s1248_s27 }
 0x2da   : > { %p1494_p0 = pnand %p1502_p6, %p2604_p13 }
 0x2dc   : > { %1815 = dma.done.wait (!%p1494_p0), %s1249_s21, 512  }
 0x2dd   : > { %1817 = vsyncadd (!%p1494_p0), %s1249_s21, 4294966784  ;;  %s22_s23 = sadd.s32 1, %s1840_s23   ;;  %s2605_s18 = smov %s1824_s19 }
 0x2de   : > { %p19_p5 = scmp.ge.s32.totalorder %s22_s23, 6   ;;  %s2606_s19 = smov %s1828_s20 }
 0x2df   : > { %s2607_s20 = smov %s2020_s17  ;;  %s2608_s21 = smov %s1836_s22 }
 0x2e0   : > { %s2609_s22 = smov %s2611_s12  ;;  %21 = sbr.rel (!%p19_p5) target bundleno = 7 (0x7), region = 101 }
 0x2e7   :  { %1254 = vsyncpa [#allocation4], 1 }
 0x2e8   :  { %1256 = vsyncpa [#allocation4 + $0x1], 1 }
 0x2e9   :  { %1257 = vsyncpa [#allocation7], 1 }
 0x2ea   :  { %1258 = vsyncpa [#allocation5], 1 }
 0x2eb   :  { %1260 = vsyncpa [#allocation5 + $0x1], 1 }

</bundles_post_ra>
